<compile_context>
chip_gen: v7x
topology: tpu7x:2x2x1
jax: 0.10.0
libtpu: 0.0.40
codegen_flags: <defaults>
</compile_context>

<pallas_src>
import functools
import numpy as np
import jax
import jax.numpy as jnp
from jax import lax
from jax.experimental import pallas as pl
from jax.experimental.pallas import tpu as pltpu


# --------------------------------------------------------------------------- #
# Kernel 1: fused, lane-dense Q/K/V projections (all heads in one dot each)    #
# --------------------------------------------------------------------------- #
def _proj_kernel(q_ref, k_ref, v_ref,
                 wq_ref, bq_ref, wk_ref, bk_ref, wv_ref, bv_ref,
                 qp_ref, kp_ref, vp_ref, *, rows, D):
    f32 = jnp.float32
    B = q_ref.shape[0]

    q2 = q_ref[...].reshape(B * rows, D)        # bf16
    k2 = k_ref[...].reshape(B * rows, D)
    v2 = v_ref[...].reshape(B * rows, D)

    # One MXU dot per tensor; f32 accumulation, bias added in f32.
    qp = jnp.dot(q2, wq_ref[...], preferred_element_type=f32) + bq_ref[...]
    kp = jnp.dot(k2, wk_ref[...], preferred_element_type=f32) + bk_ref[...]
    vp = jnp.dot(v2, wv_ref[...], preferred_element_type=f32) + bv_ref[...]

    qp_ref[...] = qp.reshape(B, rows, qp_ref.shape[2]).astype(qp_ref.dtype)
    kp_ref[...] = kp.reshape(B, rows, kp_ref.shape[2]).astype(kp_ref.dtype)
    vp_ref[...] = vp.reshape(B, rows, vp_ref.shape[2]).astype(vp_ref.dtype)


# --------------------------------------------------------------------------- #
# Kernel 2: attention over head-major groups (g = head*B + b), gridded over    #
# query-row tiles. Softmax is the legacy implicit-dim=0 softmax over g.        #
# --------------------------------------------------------------------------- #
def _attn_kernel(qg_ref, kg_ref, vg_ref, wo_ref, bo_ref, o_ref,
                 *, B, h, dv, use_subsequent_mask):
    f32 = jnp.float32
    bf16 = jnp.bfloat16

    tq = qg_ref.shape[1]
    Kseq = kg_ref.shape[1]
    D = wo_ref.shape[1]

    # Scores for every group at once (scale already folded into the Q projection).
    s = jnp.einsum('gqd,gkd->gqk', qg_ref[...], kg_ref[...],
                   preferred_element_type=f32)                 # (G, tq, Kseq) f32

    if use_subsequent_mask:
        # Additive causal mask (finite -1e30: torch's -inf would make the legacy
        # dim=0 softmax NaN). Built per q tile from the global row offset.
        q0 = pl.program_id(0) * tq
        row = lax.broadcasted_iota(jnp.int32, (tq, Kseq), 0) + q0
        col = lax.broadcasted_iota(jnp.int32, (tq, Kseq), 1)
        s = s + jnp.where(col > row, f32(-1e30), f32(0.0))

    # Legacy F.softmax implicit dim=0 on a 3-D tensor: normalize across g = head*B + b.
    m = jnp.max(s, axis=0, keepdims=True)
    e = jnp.exp(s - m)
    denom = jnp.sum(e, axis=0, keepdims=True)
    p = (e * pl.reciprocal(denom, approx=True)).astype(bf16)   # (G, tq, Kseq)

    # Attention @ V for every group in one batched dot.
    attn = jnp.einsum('gqk,gkd->gqd', p, vg_ref[...],
                      preferred_element_type=f32).astype(bf16)  # (G, tq, dv)

    # Output projection: accumulate per head into an f32 accumulator. Each dot is
    # (B*tq, dv) x (dv, D) -> lane-dense output (N = D); slices are along the major
    # group axis of `attn` (cheap) and the sublane axis of Wo.
    out = jnp.zeros((B * tq, D), f32)
    for i in range(h):
        a_i = attn[i * B:(i + 1) * B].reshape(B * tq, dv)
        out = out + jnp.dot(a_i, wo_ref[i * dv:(i + 1) * dv, :],
                            preferred_element_type=f32)
    out = out + bo_ref[...]

    o_ref[...] = out.reshape(B, tq, D).astype(o_ref.dtype)


# --------------------------------------------------------------------------- #
# Tiling helpers (generation-aware VMEM budgeting)                             #
# --------------------------------------------------------------------------- #
def _vmem_budget_bytes():
    """~75% of this chip's physical VMEM (128 MiB on v5e/v6e, 64 MiB on v7x)."""
    phys = 64 * 1024 * 1024
    try:
        info = pltpu.get_tpu_info()
        phys = int(getattr(info, "vmem_capacity_bytes", phys) or phys)
    except Exception:
        pass
    return (phys * 3) // 4


def _pick_seq_tile(S, per_row_bytes, budget_bytes, min_rows):
    """Largest row tile (multiple of 16, or the full S) whose per-row working set
    fits the budget; never below min_rows (review: keep tiles >= 128 rows)."""
    cap = int(budget_bytes // max(per_row_bytes, 1))
    cap = max(16, (cap // 16) * 16)
    t = min(S, max(min(min_rows, S), cap))
    if t >= S:
        return S
    t = max(16, (t // 16) * 16)
    # Prefer an exact divisor (no tail tile); otherwise keep t and use a cdiv grid.
    for c in range(t, 15, -16):
        if S % c == 0:
            return c
    return t


# --------------------------------------------------------------------------- #
# Wrapper                                                                      #
# --------------------------------------------------------------------------- #
def multi_head_attention(query, key, value, params, *, h, mask=None):
    """Pallas forward pass of the torch MultiHeadAttention module.
    Assumes query/key/value share the same (B, K, d_model) shape (self-attention)."""
    B, S, D = query.shape
    out_dtype = query.dtype
    Wq, bq, Wk, bk, Wv, bv, Wo, bo = params
    hq = Wq.shape[0]                  # q * h
    hv = Wv.shape[0]                  # v * h
    dq = hq // h
    dv = hv // h
    G = h * B

    f32 = jnp.float32
    bf16 = jnp.bfloat16
    scale = np.float32(1.0 / np.sqrt(S))      # torch divides scores by sqrt(K)

    # bf16 MXU inputs (halves HBM->VMEM bytes); biases stay f32 (added to f32 accum).
    q_b = query.astype(bf16)
    k_b = key.astype(bf16)
    v_b = value.astype(bf16)
    # Fold 1/sqrt(K) into the Q projection (one-time constant fold into parameters).
    wq_t = (jnp.asarray(Wq).T.astype(f32) * scale).astype(bf16)   # (D, h*dq)
    bq_r = (jnp.asarray(bq).astype(f32) * scale).reshape(1, hq)
    wk_t = jnp.asarray(Wk).T.astype(bf16)                          # (D, h*dq)
    bk_r = jnp.asarray(bk).reshape(1, hq).astype(f32)
    wv_t = jnp.asarray(Wv).T.astype(bf16)                          # (D, h*dv)
    bv_r = jnp.asarray(bv).reshape(1, hv).astype(f32)
    wo_t = jnp.asarray(Wo).T.astype(bf16)                          # (h*dv, D)
    bo_r = jnp.asarray(bo).reshape(1, D).astype(f32)

    budget = _vmem_budget_bytes()

    # ---------------- projection kernel (hoisted: runs once, not per q tile) ----
    per_row_proj = B * (
        4 * (3 * D)                # double-buffered bf16 input rows (q, k, v)
        + 4 * (2 * hq + hv)        # double-buffered bf16 output rows
        + 4 * (3 * D + 2 * hq + hv))   # f32 working copies / accumulators
    ts = _pick_seq_tile(S, per_row_proj, budget, min_rows=256)
    ns = pl.cdiv(S, ts)

    Qp, Kp, Vp = pl.pallas_call(
        functools.partial(_proj_kernel, rows=ts, D=D),
        out_shape=(jax.ShapeDtypeStruct((B, S, hq), bf16),
                   jax.ShapeDtypeStruct((B, S, hq), bf16),
                   jax.ShapeDtypeStruct((B, S, hv), bf16)),
        grid=(ns,),
        in_specs=[
            pl.BlockSpec((B, ts, D), lambda si: (0, si, 0)),
            pl.BlockSpec((B, ts, D), lambda si: (0, si, 0)),
            pl.BlockSpec((B, ts, D), lambda si: (0, si, 0)),
            pl.BlockSpec((D, hq), lambda si: (0, 0)),
            pl.BlockSpec((1, hq), lambda si: (0, 0)),
            pl.BlockSpec((D, hq), lambda si: (0, 0)),
            pl.BlockSpec((1, hq), lambda si: (0, 0)),
            pl.BlockSpec((D, hv), lambda si: (0, 0)),
            pl.BlockSpec((1, hv), lambda si: (0, 0)),
        ],
        out_specs=(
            pl.BlockSpec((B, ts, hq), lambda si: (0, si, 0)),
            pl.BlockSpec((B, ts, hq), lambda si: (0, si, 0)),
            pl.BlockSpec((B, ts, hv), lambda si: (0, si, 0)),
        ),
        compiler_params=pltpu.CompilerParams(
            dimension_semantics=("parallel",),
            vmem_limit_bytes=budget),
    )(q_b, k_b, v_b, wq_t, bq_r, wk_t, bk_r, wv_t, bv_r)

    # Head regroup (torch's chunk(dim=-1)+cat(dim=0), g = head*B + b). One-time
    # layout plumbing in the wrapper so the attention kernel sees a single batched
    # group axis and needs no per-head lane slices or concatenates.
    Qg = jnp.concatenate(jnp.split(Qp, h, axis=-1), axis=0)    # (G, S, dq) bf16
    Kg = jnp.concatenate(jnp.split(Kp, h, axis=-1), axis=0)    # (G, S, dq) bf16
    Vg = jnp.concatenate(jnp.split(Vp, h, axis=-1), axis=0)    # (G, S, dv) bf16

    # ---------------- attention kernel, gridded over query-row tiles ------------
    out_itemsize = np.dtype(out_dtype).itemsize
    resident = 4 * G * S * (dq + dv) + 4 * hv * D   # double-buffered bf16 K/V/Wo blocks
    per_row_attn = (
        3 * G * S * 4              # scores / exp / probs live f32 working set
        + 4 * G * dq               # double-buffered bf16 Q tile rows
        + G * dv * 4               # attn·V rows (f32)
        + 2 * B * D * out_itemsize # double-buffered output rows
        + B * D * 4)               # f32 output accumulator rows
    avail = max(budget - resident, budget // 8)
    tq = _pick_seq_tile(S, per_row_attn, avail, min_rows=128)
    nq = pl.cdiv(S, tq)
    # TODO(synk): for very long key sequences, add an 'arbitrary' k-axis that streams
    # K/V tiles and accumulates attn·V in VMEM scratch (legal since the legacy dim=0
    # softmax is per (q,k) element across groups).

    out = pl.pallas_call(
        functools.partial(_attn_kernel, B=B, h=h, dv=dv,
                          use_subsequent_mask=(mask == 'subsequent')),
        out_shape=jax.ShapeDtypeStruct((B, S, D), out_dtype),
        grid=(nq,),
        in_specs=[
            pl.BlockSpec((G, tq, dq), lambda qi: (0, qi, 0)),   # query tile (scaled)
            pl.BlockSpec((G, S, dq), lambda qi: (0, 0, 0)),     # full keys
            pl.BlockSpec((G, S, dv), lambda qi: (0, 0, 0)),     # full values
            pl.BlockSpec((hv, D), lambda qi: (0, 0)),           # Wo^T
            pl.BlockSpec((1, D), lambda qi: (0, 0)),            # bo
        ],
        out_specs=pl.BlockSpec((B, tq, D), lambda qi: (0, qi, 0)),
        compiler_params=pltpu.CompilerParams(
            dimension_semantics=("parallel",),      # q tiles are independent
            vmem_limit_bytes=budget),
    )(Qg, Kg, Vg, wo_t, bo_r)

    return out


# --------------------------------------------------------------------------- #
# Pure-JAX reference (transcription of the torch forward) for verification     #
# --------------------------------------------------------------------------- #
def reference(query, key, value, params, *, h, mask=None):
    Wq, bq, Wk, bk, Wv, bv, Wo, bo = params
    Kseq = query.shape[1]
    Qf = query @ Wq.T + bq
    Kf = key @ Wk.T + bk
    Vf = value @ Wv.T + bv
    Qc = jnp.concatenate(jnp.split(Qf, h, axis=-1), axis=0)
    Kc = jnp.concatenate(jnp.split(Kf, h, axis=-1), axis=0)
    Vc = jnp.concatenate(jnp.split(Vf, h, axis=-1), axis=0)
    scores = jnp.einsum('gqd,gkd->gqk', Qc, Kc) / np.sqrt(Kseq)
    if mask == 'subsequent':
        fm = jnp.triu(jnp.ones((Kseq, Kseq), bool), k=1)
        # finite mask value: torch's -inf would make the legacy dim=0 softmax NaN
        scores = jnp.where(fm, -1e30, scores)
    p = jax.nn.softmax(scores, axis=0)               # legacy F.softmax implicit dim=0
    attn = jnp.einsum('gqk,gkd->gqd', p, Vc)
    heads = jnp.concatenate(jnp.split(attn, h, axis=0), axis=-1)
    return heads @ Wo.T + bo


if __name__ == "__main__":
    # Small, module-consistent shapes: batch=2, seq K=8, d_model=32, q=v=8, h=2
    B, Kseq, D, dq, dv, h = 2, 8, 32, 8, 8, 2

    key0 = jax.random.PRNGKey(0)
    ks = jax.random.split(key0, 12)
    query = jax.random.normal(ks[0], (B, Kseq, D), jnp.float32)
    key_t = jax.random.normal(ks[1], (B, Kseq, D), jnp.float32)
    value = jax.random.normal(ks[2], (B, Kseq, D), jnp.float32)

    # Deterministic parameter init (nn.Linear shapes: weight (out, in), bias (out,))
    def init_w(k, out_f, in_f):
        return jax.random.normal(k, (out_f, in_f), jnp.float32) * 0.1

    Wq = init_w(ks[3], dq * h, D); bq = jax.random.normal(ks[4], (dq * h,), jnp.float32) * 0.1
    Wk = init_w(ks[5], dq * h, D); bk = jax.random.normal(ks[6], (dq * h,), jnp.float32) * 0.1
    Wv = init_w(ks[7], dv * h, D); bv = jax.random.normal(ks[8], (dv * h,), jnp.float32) * 0.1
    Wo = init_w(ks[9], D, h * dv); bo = jax.random.normal(ks[10], (D,), jnp.float32) * 0.1
    params = (Wq, bq, Wk, bk, Wv, bv, Wo, bo)

    out = multi_head_attention(query, key_t, value, params, h=h, mask=None)
    out = jax.block_until_ready(out)

    ref = reference(query, key_t, value, params, h=h, mask=None)
    assert out.shape == (B, Kseq, D)
    assert np.allclose(np.asarray(out), np.asarray(ref), rtol=2e-2, atol=2e-2), \
        "Pallas output does not match JAX reference"

    print("KERNEL_OK")
</pallas_src>

<mosaic_0001>
module attributes {stable_mosaic.version = 11 : i64} {
  func.func @_proj_kernel(%arg0: i32, %arg1: memref<2x8x32xbf16, #tpu.memory_space<vmem>>, %arg2: memref<2x8x32xbf16, #tpu.memory_space<vmem>>, %arg3: memref<2x8x32xbf16, #tpu.memory_space<vmem>>, %arg4: memref<32x16xbf16, #tpu.memory_space<vmem>>, %arg5: memref<1x16xf32, #tpu.memory_space<vmem>>, %arg6: memref<32x16xbf16, #tpu.memory_space<vmem>>, %arg7: memref<1x16xf32, #tpu.memory_space<vmem>>, %arg8: memref<32x16xbf16, #tpu.memory_space<vmem>>, %arg9: memref<1x16xf32, #tpu.memory_space<vmem>>, %arg10: memref<2x8x16xbf16, #tpu.memory_space<vmem>>, %arg11: memref<2x8x16xbf16, #tpu.memory_space<vmem>>, %arg12: memref<2x8x16xbf16, #tpu.memory_space<vmem>>) attributes {dimension_semantics = [#tpu.dimension_semantics<parallel>], iteration_bounds = array<i64: 1>, scalar_prefetch = 0 : i64, scratch_operands = 0 : i64, tpu.core_type = #tpu.core_type<tc>, window_params = [{transform_indices = @transform_0, window_bounds = array<i64: 2, 8, 32>}, {transform_indices = @transform_1, window_bounds = array<i64: 2, 8, 32>}, {transform_indices = @transform_2, window_bounds = array<i64: 2, 8, 32>}, {pipeline_mode = #tpu.pipeline_mode<synchronous>, transform_indices = @transform_3, window_bounds = array<i64: 32, 16>}, {pipeline_mode = #tpu.pipeline_mode<synchronous>, transform_indices = @transform_4, window_bounds = array<i64: 1, 16>}, {pipeline_mode = #tpu.pipeline_mode<synchronous>, transform_indices = @transform_5, window_bounds = array<i64: 32, 16>}, {pipeline_mode = #tpu.pipeline_mode<synchronous>, transform_indices = @transform_6, window_bounds = array<i64: 1, 16>}, {pipeline_mode = #tpu.pipeline_mode<synchronous>, transform_indices = @transform_7, window_bounds = array<i64: 32, 16>}, {pipeline_mode = #tpu.pipeline_mode<synchronous>, transform_indices = @transform_8, window_bounds = array<i64: 1, 16>}, {transform_indices = @transform_9, window_bounds = array<i64: 2, 8, 16>}, {transform_indices = @transform_10, window_bounds = array<i64: 2, 8, 16>}, {transform_indices = @transform_11, window_bounds = array<i64: 2, 8, 16>}]} {
    %c0 = arith.constant 0 : index
    %c0_0 = arith.constant 0 : index
    %c0_1 = arith.constant 0 : index
    %0 = vector.load %arg1[%c0, %c0_0, %c0_1] : memref<2x8x32xbf16, #tpu.memory_space<vmem>>, vector<2x8x32xbf16>
    %1 = vector.shape_cast %0 : vector<2x8x32xbf16> to vector<16x32xbf16>
    %c0_2 = arith.constant 0 : index
    %c0_3 = arith.constant 0 : index
    %c0_4 = arith.constant 0 : index
    %2 = vector.load %arg2[%c0_2, %c0_3, %c0_4] : memref<2x8x32xbf16, #tpu.memory_space<vmem>>, vector<2x8x32xbf16>
    %3 = vector.shape_cast %2 : vector<2x8x32xbf16> to vector<16x32xbf16>
    %c0_5 = arith.constant 0 : index
    %c0_6 = arith.constant 0 : index
    %c0_7 = arith.constant 0 : index
    %4 = vector.load %arg3[%c0_5, %c0_6, %c0_7] : memref<2x8x32xbf16, #tpu.memory_space<vmem>>, vector<2x8x32xbf16>
    %5 = vector.shape_cast %4 : vector<2x8x32xbf16> to vector<16x32xbf16>
    %c0_8 = arith.constant 0 : index
    %c0_9 = arith.constant 0 : index
    %6 = vector.load %arg4[%c0_8, %c0_9] : memref<32x16xbf16, #tpu.memory_space<vmem>>, vector<32x16xbf16>
    %cst = arith.constant dense<0.000000e+00> : vector<16x16xf32>
    %7 = tpu.matmul %1, %6, %cst {dimension_numbers = #tpu.dot_dimension_numbers<[1], [0], [0], [1], [0, 0, 1, 1], [], []>} : vector<16x32xbf16>, vector<32x16xbf16>, vector<16x16xf32> -> vector<16x16xf32>
    %c0_10 = arith.constant 0 : index
    %c0_11 = arith.constant 0 : index
    %8 = vector.load %arg5[%c0_10, %c0_11] : memref<1x16xf32, #tpu.memory_space<vmem>>, vector<1x16xf32>
    %9 = vector.broadcast %8 : vector<1x16xf32> to vector<16x16xf32>
    %10 = arith.addf %7, %9 : vector<16x16xf32>
    %c0_12 = arith.constant 0 : index
    %c0_13 = arith.constant 0 : index
    %11 = vector.load %arg6[%c0_12, %c0_13] : memref<32x16xbf16, #tpu.memory_space<vmem>>, vector<32x16xbf16>
    %cst_14 = arith.constant dense<0.000000e+00> : vector<16x16xf32>
    %12 = tpu.matmul %3, %11, %cst_14 {dimension_numbers = #tpu.dot_dimension_numbers<[1], [0], [0], [1], [0, 0, 1, 1], [], []>} : vector<16x32xbf16>, vector<32x16xbf16>, vector<16x16xf32> -> vector<16x16xf32>
    %c0_15 = arith.constant 0 : index
    %c0_16 = arith.constant 0 : index
    %13 = vector.load %arg7[%c0_15, %c0_16] : memref<1x16xf32, #tpu.memory_space<vmem>>, vector<1x16xf32>
    %14 = vector.broadcast %13 : vector<1x16xf32> to vector<16x16xf32>
    %15 = arith.addf %12, %14 : vector<16x16xf32>
    %c0_17 = arith.constant 0 : index
    %c0_18 = arith.constant 0 : index
    %16 = vector.load %arg8[%c0_17, %c0_18] : memref<32x16xbf16, #tpu.memory_space<vmem>>, vector<32x16xbf16>
    %cst_19 = arith.constant dense<0.000000e+00> : vector<16x16xf32>
    %17 = tpu.matmul %5, %16, %cst_19 {dimension_numbers = #tpu.dot_dimension_numbers<[1], [0], [0], [1], [0, 0, 1, 1], [], []>} : vector<16x32xbf16>, vector<32x16xbf16>, vector<16x16xf32> -> vector<16x16xf32>
    %c0_20 = arith.constant 0 : index
    %c0_21 = arith.constant 0 : index
    %18 = vector.load %arg9[%c0_20, %c0_21] : memref<1x16xf32, #tpu.memory_space<vmem>>, vector<1x16xf32>
    %19 = vector.broadcast %18 : vector<1x16xf32> to vector<16x16xf32>
    %20 = arith.addf %17, %19 : vector<16x16xf32>
    %21 = vector.shape_cast %10 : vector<16x16xf32> to vector<2x8x16xf32>
    %22 = arith.truncf %21 : vector<2x8x16xf32> to vector<2x8x16xbf16>
    %c0_22 = arith.constant 0 : index
    %c0_23 = arith.constant 0 : index
    %c0_24 = arith.constant 0 : index
    %23 = vector.load %arg10[%c0_22, %c0_23, %c0_24] : memref<2x8x16xbf16, #tpu.memory_space<vmem>>, vector<2x8x16xbf16>
    tpu.vector_store %arg10[%c0_22, %c0_23, %c0_24], %22 {strides = array<i32>} : memref<2x8x16xbf16, #tpu.memory_space<vmem>>, vector<2x8x16xbf16>,
    %24 = vector.shape_cast %15 : vector<16x16xf32> to vector<2x8x16xf32>
    %25 = arith.truncf %24 : vector<2x8x16xf32> to vector<2x8x16xbf16>
    %c0_25 = arith.constant 0 : index
    %c0_26 = arith.constant 0 : index
    %c0_27 = arith.constant 0 : index
    %26 = vector.load %arg11[%c0_25, %c0_26, %c0_27] : memref<2x8x16xbf16, #tpu.memory_space<vmem>>, vector<2x8x16xbf16>
    tpu.vector_store %arg11[%c0_25, %c0_26, %c0_27], %25 {strides = array<i32>} : memref<2x8x16xbf16, #tpu.memory_space<vmem>>, vector<2x8x16xbf16>,
    %27 = vector.shape_cast %20 : vector<16x16xf32> to vector<2x8x16xf32>
    %28 = arith.truncf %27 : vector<2x8x16xf32> to vector<2x8x16xbf16>
    %c0_28 = arith.constant 0 : index
    %c0_29 = arith.constant 0 : index
    %c0_30 = arith.constant 0 : index
    %29 = vector.load %arg12[%c0_28, %c0_29, %c0_30] : memref<2x8x16xbf16, #tpu.memory_space<vmem>>, vector<2x8x16xbf16>
    tpu.vector_store %arg12[%c0_28, %c0_29, %c0_30], %28 {strides = array<i32>} : memref<2x8x16xbf16, #tpu.memory_space<vmem>>, vector<2x8x16xbf16>,
    return
  }
  func.func @transform_0(%arg0: i32) -> (i32, i32, i32) {
    %c0_i32 = arith.constant 0 : i32
    %c0_i32_0 = arith.constant 0 : i32
    %c0_i32_1 = arith.constant 0 : i32
    return %c0_i32, %arg0, %c0_i32_0 : i32, i32, i32
  }
  func.func @transform_1(%arg0: i32) -> (i32, i32, i32) {
    %c0_i32 = arith.constant 0 : i32
    %c0_i32_0 = arith.constant 0 : i32
    %c0_i32_1 = arith.constant 0 : i32
    return %c0_i32, %arg0, %c0_i32_0 : i32, i32, i32
  }
  func.func @transform_2(%arg0: i32) -> (i32, i32, i32) {
    %c0_i32 = arith.constant 0 : i32
    %c0_i32_0 = arith.constant 0 : i32
    %c0_i32_1 = arith.constant 0 : i32
    return %c0_i32, %arg0, %c0_i32_0 : i32, i32, i32
  }
  func.func @transform_3(%arg0: i32) -> (i32, i32) {
    %c0_i32 = arith.constant 0 : i32
    %c0_i32_0 = arith.constant 0 : i32
    %c0_i32_1 = arith.constant 0 : i32
    return %c0_i32, %c0_i32_0 : i32, i32
  }
  func.func @transform_4(%arg0: i32) -> (i32, i32) {
    %c0_i32 = arith.constant 0 : i32
    %c0_i32_0 = arith.constant 0 : i32
    %c0_i32_1 = arith.constant 0 : i32
    return %c0_i32, %c0_i32_0 : i32, i32
  }
  func.func @transform_5(%arg0: i32) -> (i32, i32) {
    %c0_i32 = arith.constant 0 : i32
    %c0_i32_0 = arith.constant 0 : i32
    %c0_i32_1 = arith.constant 0 : i32
    return %c0_i32, %c0_i32_0 : i32, i32
  }
  func.func @transform_6(%arg0: i32) -> (i32, i32) {
    %c0_i32 = arith.constant 0 : i32
    %c0_i32_0 = arith.constant 0 : i32
    %c0_i32_1 = arith.constant 0 : i32
    return %c0_i32, %c0_i32_0 : i32, i32
  }
  func.func @transform_7(%arg0: i32) -> (i32, i32) {
    %c0_i32 = arith.constant 0 : i32
    %c0_i32_0 = arith.constant 0 : i32
    %c0_i32_1 = arith.constant 0 : i32
    return %c0_i32, %c0_i32_0 : i32, i32
  }
  func.func @transform_8(%arg0: i32) -> (i32, i32) {
    %c0_i32 = arith.constant 0 : i32
    %c0_i32_0 = arith.constant 0 : i32
    %c0_i32_1 = arith.constant 0 : i32
    return %c0_i32, %c0_i32_0 : i32, i32
  }
  func.func @transform_9(%arg0: i32) -> (i32, i32, i32) {
    %c0_i32 = arith.constant 0 : i32
    %c0_i32_0 = arith.constant 0 : i32
    %c0_i32_1 = arith.constant 0 : i32
    return %c0_i32, %arg0, %c0_i32_0 : i32, i32, i32
  }
  func.func @transform_10(%arg0: i32) -> (i32, i32, i32) {
    %c0_i32 = arith.constant 0 : i32
    %c0_i32_0 = arith.constant 0 : i32
    %c0_i32_1 = arith.constant 0 : i32
    return %c0_i32, %arg0, %c0_i32_0 : i32, i32, i32
  }
  func.func @transform_11(%arg0: i32) -> (i32, i32, i32) {
    %c0_i32 = arith.constant 0 : i32
    %c0_i32_0 = arith.constant 0 : i32
    %c0_i32_1 = arith.constant 0 : i32
    return %c0_i32, %arg0, %c0_i32_0 : i32, i32, i32
  }
}

</mosaic_0001>

<bundles_post_ra>
// kernel: tpu_custom_call.1
= control target key start
LH: loop header
LB: loop body
LE: loop exit
PB: predicated region body
PF: predicated region fallthrough
CT: control target
= control target key end

     0   :  { %17 = vsyncpa [#allocation3], 0  ;;  %v455_v1 = vmov 0.0   ;;  %vm456_vm0 = vmmov 0   ;;  %vm72_vm1 = vcmask 261120   ;;  %s619_s0 = inlined_call_operand.vmem [shape: bf16[2,8,32], index: 0, kind: input, shape index: {}]   ;;  %s620_s1 = inlined_call_operand.vmem [shape: bf16[2,8,32], index: 1, kind: input, shape index: {}]   ;;  %s621_s2 = inlined_call_operand.vmem [shape: bf16[2,8,32], index: 2, kind: input, shape index: {}]   ;;  %s622_s3 = inlined_call_operand.vmem [shape: bf16[32,16], index: 3, kind: input, shape index: {}]   ;;  %s623_s4 = inlined_call_operand.vmem [shape: f32[1,16], index: 4, kind: input, shape index: {}]   ;;  %s624_s5 = inlined_call_operand.vmem [shape: bf16[32,16], index: 5, kind: input, shape index: {}]   ;;  %s625_s6 = inlined_call_operand.vmem [shape: f32[1,16], index: 6, kind: input, shape index: {}]   ;;  %s626_s7 = inlined_call_operand.vmem [shape: bf16[32,16], index: 7, kind: input, shape index: {}]   ;;  %s627_s8 = inlined_call_operand.vmem [shape: f32[1,16], index: 8, kind: input, shape index: {}]   ;;  %s628_s9 = inlined_call_operand.hbm [shape: bf16[2,8,16], index: 9, kind: output, shape index: {0}]   ;;  %s629_s10 = inlined_call_operand.hbm [shape: bf16[2,8,16], index: 10, kind: output, shape index: {1}]   ;;  %s630_s11 = inlined_call_operand.hbm [shape: bf16[2,8,16], index: 11, kind: output, shape index: {2}]  }
   0x1   :  { %v376_v0 = vld [vmem:[%s622_s3] sm:$0xff]   ;;  %345 = vmatprep.subr.bf16.mxu0 %v455_v1  ;;  %v377_v2 = vld [vmem:[%s622_s3 + $0x8] sm:$0xff]   ;;  %353 = vmatprep.subr.bf16.mxu1 %v455_v1 }
   0x2   :  { %346 = vmatpush3.bf16.msra.mxu0 %v376_v0  ;;  %v378_v3 = vld [vmem:[%s624_s5] sm:$0xff]   ;;  %349 = vmatprep.mubr.msk.bf16.mxu0 %vm456_vm0, %v455_v1  ;;  %v381_v5 = vld [vmem:[%s624_s5 + $0x8] sm:$0xff]  }
   0x3   :  { %347 = vmatprep.subr.bf16.mxu0 %v455_v1  ;;  %357 = vmatprep.mubr.msk.bf16.mxu1 %vm456_vm0, %v455_v1  ;;  %v379_v4 = vld [vmem:[%s619_s0] sm:$0xff]  }
   0x4   :  { %354 = vmatpush3.bf16.msra.mxu1 %v378_v3  ;;  %v380_v6 = vld [vmem:[%s626_s7] sm:$0xff]  }
   0x5   :  { %355 = vmatprep.subr.bf16.mxu1 %v455_v1  ;;  %v382_v7 = vld [vmem:[%s620_s1] sm:$0xff]  }
   0x6   :  { %348 = vmatpush3.bf16.msra.mxu0 %v377_v2 }
   0x7   :  { %361 = vmatprep.subr.bf16.mxu0 %v455_v1 }
   0x8   :  { %356 = vmatpush3.bf16.msra.mxu1 %v381_v5 }
   0x9   :  { %350 = vmatmul.mubr.msk.bf16.vlgmr.msra.gmra.mrb[0].mxu0 %vm72_vm1, %v379_v4 }
   0xa   :  { %18 = vsyncpa [#allocation5], 0  ;;  %362 = vmatpush3.bf16.msra.mxu0 %v380_v6  ;;  %v383_v8 = vld [vmem:[%s626_s7 + $0x8] sm:$0xff]   ;;  %365 = vmatprep.mubr.msk.bf16.mxu0 %vm456_vm0, %v455_v1  ;;  %v384_v9 = vld [vmem:[%s621_s2] sm:$0xff]   ;;  %vm263_vm2 = vcmask 125952   ;;  %s457_s7 = smov [#allocation2]  }
   0xb   :  { %363 = vmatprep.subr.bf16.mxu0 %v455_v1  ;;  %358 = vmatmul.mubr.msk.bf16.vlgmr.msra.gmra.mrb[0].mxu1 %vm72_vm1, %v382_v7  ;;  %v321_v10 = vld [vmem:[%s623_s4] ss:$0 sm:$0xff]  ;;  %s279_s16 = sshll.u32 %s457_s7, 4  ;;  %s458_s2 = smov [#allocation4]   ;;  %s280_s16 = int_to_ptr.vmem [resolvable:$true] %s279_s16 }
   0xc   :  { %v326_v12 = vld [vmem:[%s625_s6] ss:$0 sm:$0xff]  ;;  %s291_s4 = sshll.u32 %s458_s2, 4  ;;  %s385_s18 = scalar_lea.vmem %s280_s16, 128  ;;  %s564_s4 = int_to_ptr.vmem [resolvable:$true] %s291_s4 }
   0xd   :  { %v331_v27 = vld [vmem:[%s627_s8] ss:$0 sm:$0xff]  ;;  %p386_p0 = scmp.ne.s32.totalorder %s280_s16, %s385_s18  ;;  %p390_p1 = scmp.lt.s32.totalorder %s280_s16, %s280_s16 }
   0xe   :  { %364 = vmatpush3.bf16.msra.mxu0 %v383_v8  ;;  %p391_p2 = scmp.lt.s32.totalorder %s385_s18, %s385_s18 }
  0x10   :  { %p392_p3 = por %p391_p2, %p390_p1 }
  0x11   :  { %366 = vmatmul.mubr.msk.bf16.vlgmr.msra.gmra.mrb[4].mxu0 %vm72_vm1, %v384_v9 }
  0x12   :  { %p393_p4 = pnand %p392_p3, %p386_p0 }
  0xdc   :  { %v110_v11 = vpop.f32.mrb[0].mxu0 }
  0xdd   :  { %v111_v13 = vadd.f32 %v321_v10, %v110_v11  ;;  %v351_v14 = vpop.f32.mrb[1].mxu0 }
  0xde   :  { %v113_v15 = vpop.f32.mrb[2].mxu0  ;;  %v182_v16 = vpop.f32.mrb[0].mxu1 }
  0xdf   :  { %v261_v17 = vpack.c.bf16 %v111_v13, %v111_v13  ;;  %v114_v18 = vadd.f32 %v321_v10, %v113_v15  ;;  %v352_v19 = vpop.f32.mrb[3].mxu0  ;;  %v183_v20 = vadd.f32 %v326_v12, %v182_v16  ;;  %v359_v21 = vpop.f32.mrb[1].mxu1 }
  0xe0   :  { %v185_v22 = vpop.f32.mrb[2].mxu1 }
  0xe1   :  { %264 = vst.msk [vmem:[#allocation2] sm:$0xf] %vm263_vm2, %v261_v17  ;;  %v262_v23 = vpack.c.bf16 %v114_v18, %v114_v18  ;;  %v266_v24 = vpack.c.bf16 %v183_v20, %v183_v20  ;;  %v186_v25 = vadd.f32 %v326_v12, %v185_v22  ;;  %v360_v26 = vpop.f32.mrb[3].mxu1 }
  0xe3   :  { %265 = vst.msk [vmem:[#allocation2 + $0x4] sm:$0xf] %vm263_vm2, %v262_v23  ;;  %268 = vst.msk [vmem:[#allocation4] sm:$0xf] %vm263_vm2, %v266_v24  ;;  %v267_v28 = vpack.c.bf16 %v186_v25, %v186_v25 }
  0xe4   :  { %v254_v29 = vpop.f32.mrb[4].mxu0 }
  0xe5   :  { %396 = shalt.err (!%p393_p4)
}
  0xe6   :  { %s397_s21 = scalar_lea.hbm %s628_s9, 128 }
  0xe7   :  { %p398_p5 = scmp.ne.s32.totalorder %s628_s9, %s397_s21  ;;  %p401_p6 = scmp.lt.u32.totalorder %s397_s21, %s628_s9 }
  0xe9   :  { %p403_p7 = pnand %p401_p6, %p398_p5 }
  0xeb   :  { %406 = shalt.err (!%p403_p7)
}
  0xec   :  { %s459_s25 = smov 64   ;;  %s460_s3 = smov 4   ;;  %269 = vst.msk [vmem:[#allocation4 + $0x4] sm:$0xf] %vm263_vm2, %v267_v28  ;;  %v255_v30 = vadd.f32 %v331_v27, %v254_v29  ;;  %v367_v31 = vpop.f32.mrb[5].mxu0 }
  0xed   :  { %285 = dma.vmem_to_hbm [thread:$0]  %s280_s16, 128, %s628_s9, [#allocation3], %s459_s25, %s459_s25, %s460_s3   ;;  %v257_v32 = vpop.f32.mrb[6].mxu0 }
  0xee   :  { %s461_s28 = smov [#allocation6]   ;;  %s407_s0 = scalar_lea.vmem %s564_s4, 128 }
  0xef   :  { %s303_s29 = sshll.u32 %s461_s28, 4  ;;  %p408_p8 = scmp.ne.s32.totalorder %s564_s4, %s407_s0  ;;  %s304_s29 = int_to_ptr.vmem [resolvable:$true] %s303_s29 }
  0xf0   :  { %p412_p9 = scmp.lt.s32.totalorder %s564_s4, %s564_s4  ;;  %p413_p10 = scmp.lt.s32.totalorder %s407_s0, %s407_s0 }
  0xf2   :  { %p414_p11 = por %p413_p10, %p412_p9 }
  0xf4   :  { %p415_p12 = pnand %p414_p11, %p408_p8 }
  0xf6   :  { %418 = shalt.err (!%p415_p12)
}
  0xf7   :  { %s419_s12 = scalar_lea.hbm %s629_s10, 128 }
  0xf8   :  { %p420_p13 = scmp.ne.s32.totalorder %s629_s10, %s419_s12  ;;  %p423_p0 = scmp.lt.u32.totalorder %s419_s12, %s629_s10 }
  0xfa   :  { %p425_p1 = pnand %p423_p0, %p420_p13 }
  0xfc   :  { %428 = shalt.err (!%p425_p1)
}
  0xfd   :  { %297 = dma.vmem_to_hbm [thread:$0]  %s564_s4, 128, %s629_s10, [#allocation5], %s459_s25, %s459_s25, %s460_s3   ;;  %v270_v33 = vpack.c.bf16 %v255_v30, %v255_v30  ;;  %v258_v34 = vadd.f32 %v331_v27, %v257_v32  ;;  %v368_v35 = vpop.f32.mrb[7].mxu0 }
  0xfe   :  { %s429_s16 = scalar_lea.vmem %s304_s29, 128  ;;  %p434_p3 = scmp.lt.s32.totalorder %s304_s29, %s304_s29 }
  0xff   :  { %272 = vst.msk [vmem:[#allocation6] sm:$0xf] %vm263_vm2, %v270_v33  ;;  %v271_v36 = vpack.c.bf16 %v258_v34, %v258_v34  ;;  %p430_p2 = scmp.ne.s32.totalorder %s304_s29, %s429_s16  ;;  %p435_p4 = scmp.lt.s32.totalorder %s429_s16, %s429_s16 }
 0x101   :  { %273 = vst.msk [vmem:[#allocation6 + $0x4] sm:$0xf] %vm263_vm2, %v271_v36  ;;  %p436_p5 = por %p435_p4, %p434_p3 }
 0x103   :  { %p437_p6 = pnand %p436_p5, %p430_p2 }
 0x105   :  { %440 = shalt.err (!%p437_p6)
}
 0x106   :  { %s441_s10 = scalar_lea.hbm %s630_s11, 128 }
 0x107   :  { %p442_p7 = scmp.ne.s32.totalorder %s630_s11, %s441_s10  ;;  %p445_p8 = scmp.lt.u32.totalorder %s441_s10, %s630_s11 }
 0x109   :  { %p447_p9 = pnand %p445_p8, %p442_p7 }
 0x10b   :  { %450 = shalt.err (!%p447_p9)
}
 0x10c   :  { %309 = dma.vmem_to_hbm [thread:$0]  %s304_s29, 128, %s630_s11, [#allocation5], %s459_s25, %s459_s25, %s460_s3  }
 0x10d   :  { %451 = dma.done.wait [#allocation3], 128  }
 0x10e   :  { %452 = vsyncadd [#allocation3], 4294967168 }
 0x10f   :  { %453 = dma.done.wait [#allocation5], 256  }
 0x110   :  { %454 = vsyncadd [#allocation5], 4294967040 }
 0x111   :  { %319 = vsyncpa [#allocation3], 1 }
 0x112   :  { %320 = vsyncpa [#allocation5], 1 }

</bundles_post_ra>
